<compile_context>
chip_gen: v5e
topology: v5e:2x2
jax: 0.10.0
libtpu: 0.0.40
codegen_flags: <defaults>
</compile_context>

<pallas_src>
import jax
import jax.numpy as jnp
from jax.experimental import pallas as pl
from jax.experimental.pallas import tpu as pltpu


def _copy_kernel(x_ref, o_ref):
    # Pure copy: the BlockSpec already DMA'd exactly the last-token rows.
    o_ref[...] = x_ref[...]


def _select_tiles(B: int, D: int, itemsize: int, vmem_budget_bytes: int):
    """Pick (TB, TD) batch/feature tile sizes for the copy pipeline.

    Live VMEM per step ~= 2 buffers x (in + out) x TB x TD x itemsize.
    """
    packing = max(1, 4 // itemsize)      # elements per 32-bit sublane word
    sublane = 8 * packing                # 8 (f32) / 16 (bf16) / 32 (int8/fp8)
    min_tb = min(B, sublane)

    # Prefer untiled D: longest contiguous lane-dense rows, fewest grid steps.
    TD = D
    if 4 * min_tb * D * itemsize > vmem_budget_bytes and D % 128 == 0:
        # Largest multiple-of-128 *divisor* of D that fits the budget, so the
        # fixed column offset (T-1)*D stays an exact multiple of TD.
        cap_cols = max(128, vmem_budget_bytes // (4 * min_tb * itemsize))
        td = 128
        for cand in range(128, min(D, cap_cols) + 1, 128):
            if D % cand == 0:
                td = cand
        TD = td

    if B <= sublane:
        return B, TD                     # full-dim batch block: always legal

    # Large batch tiles (step overhead dominates a zero-compute kernel),
    # capped by the VMEM budget, with >= 2 blocks so v7x's 2 TCs both work.
    tb_cap = (vmem_budget_bytes // (4 * TD * itemsize)) // sublane * sublane
    tb_cap = max(sublane, tb_cap)
    tb = min(1024, -(-B // 2), tb_cap)
    tb = -(-tb // sublane) * sublane     # round UP -> full-packed, unmasked vst
    return int(min(tb, B)), int(TD)


def last_token_pool(
    x: jax.Array,
    *,
    small_output_bytes: int = 1 << 20,   # below this, the XLA slice wins
    vmem_budget_bytes: int = 16 << 20,   # live double-buffered tiles (v7x-safe)
    force_pallas: bool = False,
) -> jax.Array:
    """(B, T, D) -> (B, D): take the last token along T."""
    B, T, D = x.shape
    itemsize = jnp.dtype(x.dtype).itemsize
    out_bytes = B * D * itemsize

    # XLA fast path: lane-sparse feature dims (would force masked vst.msk) or
    # tiny outputs (pallas_call launch overhead alone exceeds the copy time).
    if not force_pallas and (D % 128 != 0 or out_bytes < small_output_bytes):
        return x[:, -1, :]

    # Free contiguous reshape: the last token's features for batch row b are
    # the contiguous columns [(T-1)*D, T*D) of the flattened (B, T*D) array,
    # so one strided (row stride T*D) rectangular DMA per tile fetches exactly
    # the needed data — 1/T of the naive whole-sequence HBM traffic.
    x2 = x.reshape(B, T * D)

    TB, TD = _select_tiles(B, D, itemsize, vmem_budget_bytes)
    col_block0 = ((T - 1) * D) // TD     # exact: TD divides D by construction

    grid = (pl.cdiv(B, TB), pl.cdiv(D, TD))

    return pl.pallas_call(
        _copy_kernel,
        out_shape=jax.ShapeDtypeStruct((B, D), x.dtype),
        grid_spec=pltpu.PrefetchScalarGridSpec(
            num_scalar_prefetch=0,
            grid=grid,
            in_specs=[
                pl.BlockSpec((TB, TD), lambda b, d: (b, col_block0 + d)),
            ],
            out_specs=pl.BlockSpec((TB, TD), lambda b, d: (b, d)),
        ),
        compiler_params=pltpu.CompilerParams(
            dimension_semantics=("parallel", "parallel"),
            vmem_limit_bytes=32 * 1024 * 1024,
        ),
    )(x2)


class LastTokenPooling:
    """JAX/Pallas port of the PyTorch LastTokenPooling module."""

    def __init__(self, pre_head_pooling: bool = True) -> None:
        self.pre_head_pooling = pre_head_pooling

    def __call__(self, last_hidden_state=None, logits=None):
        if self.pre_head_pooling:
            assert last_hidden_state is not None, (
                "last_hidden_state must be provided when pre_head is True"
            )
            return last_token_pool(last_hidden_state)
        else:
            assert logits is not None, (
                "logits must be provided when pre_head is False"
            )
            return last_token_pool(logits)


if __name__ == "__main__":
    key = jax.random.PRNGKey(0)
    k1, k2, k3, k4 = jax.random.split(key, 4)

    # Module semantics at small shapes (hits the XLA fast path: tiny outputs).
    B, T, D, C = 2, 8, 128, 5
    last_hidden_state = jax.random.normal(k1, (B, T, D), dtype=jnp.float32)
    pool_pre = LastTokenPooling(pre_head_pooling=True)
    pooled_hidden = pool_pre(last_hidden_state=last_hidden_state)
    jax.block_until_ready(pooled_hidden)
    assert pooled_hidden.shape == (B, D)
    assert pooled_hidden.dtype == last_hidden_state.dtype
    assert jnp.array_equal(pooled_hidden, last_hidden_state[:, -1, :])

    logits = jax.random.normal(k2, (B, T, C), dtype=jnp.float32)
    pool_post = LastTokenPooling(pre_head_pooling=False)
    pooled_logits = pool_post(logits=logits)
    jax.block_until_ready(pooled_logits)
    assert pooled_logits.shape == (B, C)
    assert jnp.array_equal(pooled_logits, logits[:, -1, :])

    # Exercise the Pallas kernel itself at small shapes (forced past the
    # small-output fallback).  TB = B = 2 (full dim), TD = D = 128.
    y1 = last_token_pool(last_hidden_state, force_pallas=True)
    jax.block_until_ready(y1)
    assert jnp.array_equal(y1, last_hidden_state[:, -1, :])

    # bf16, multi-block batch: sublane packing 16 -> TB = 16, grid (2, 1),
    # so the "parallel" batch axis has 2 blocks (v7x megacore sharding).
    B2, T2, D2 = 32, 8, 256
    x2 = jax.random.normal(k3, (B2, T2, D2), dtype=jnp.bfloat16)
    y2 = last_token_pool(x2, force_pallas=True)
    jax.block_until_ready(y2)
    assert y2.shape == (B2, D2) and y2.dtype == x2.dtype
    assert jnp.array_equal(y2, x2[:, -1, :])

    # f32 with B not a multiple of the batch tile (boundary-block handling).
    B3, T3, D3 = 20, 4, 128
    x3 = jax.random.normal(k4, (B3, T3, D3), dtype=jnp.float32)
    y3 = last_token_pool(x3, force_pallas=True)
    jax.block_until_ready(y3)
    assert y3.shape == (B3, D3)
    assert jnp.array_equal(y3, x3[:, -1, :])

    print("KERNEL_OK")
</pallas_src>

<mosaic_0001>
module attributes {stable_mosaic.version = 11 : i64} {
  func.func @_copy_kernel(%arg0: i32, %arg1: i32, %arg2: memref<2x128xf32, #tpu.memory_space<vmem>>, %arg3: memref<2x128xf32, #tpu.memory_space<vmem>>) attributes {dimension_semantics = [#tpu.dimension_semantics<parallel>, #tpu.dimension_semantics<parallel>], iteration_bounds = array<i64: 1, 1>, scalar_prefetch = 0 : i64, scratch_operands = 0 : i64, tpu.core_type = #tpu.core_type<tc>, window_params = [{transform_indices = @transform_0, window_bounds = array<i64: 2, 128>}, {transform_indices = @transform_1, window_bounds = array<i64: 2, 128>}]} {
    %c0 = arith.constant 0 : index
    %c0_0 = arith.constant 0 : index
    %0 = vector.load %arg2[%c0, %c0_0] : memref<2x128xf32, #tpu.memory_space<vmem>>, vector<2x128xf32>
    %c0_1 = arith.constant 0 : index
    %c0_2 = arith.constant 0 : index
    %1 = vector.load %arg3[%c0_1, %c0_2] : memref<2x128xf32, #tpu.memory_space<vmem>>, vector<2x128xf32>
    tpu.vector_store %arg3[%c0_1, %c0_2], %0 {strides = array<i32>} : memref<2x128xf32, #tpu.memory_space<vmem>>, vector<2x128xf32>,
    return
  }
  func.func @transform_0(%arg0: i32, %arg1: i32) -> (i32, i32) {
    %c7_i32 = arith.constant 7 : i32
    %0 = arith.addi %c7_i32, %arg1 : i32
    %c0_i32 = arith.constant 0 : i32
    return %arg0, %0 : i32, i32
  }
  func.func @transform_1(%arg0: i32, %arg1: i32) -> (i32, i32) {
    %c0_i32 = arith.constant 0 : i32
    return %arg0, %arg1 : i32, i32
  }
}

</mosaic_0001>

<bundles_post_ra>
// kernel: tpu_custom_call.1
= control target key start
LH: loop header
LB: loop body
LE: loop exit
PB: predicated region body
PF: predicated region fallthrough
CT: control target
= control target key end

     0   :  { %6 = vsyncpa [#allocation3], 0  ;;  %s119_s0 = inlined_call_operand.hbm [shape: f32[2,1024], index: 0, kind: input, shape index: {}]   ;;  %s120_s1 = inlined_call_operand.hbm [shape: f32[2,128], index: 1, kind: output, shape index: {}]  }
   0x1   :  { %7 = vsyncpa [#allocation4], 0  ;;  %s46_s8 = scalar_lea.hbm %s119_s0, 14  ;;  %s101_s10 = smov [#allocation2]  }
   0x2   :  { %s16_s9 = sshll.u32 %s46_s8, 4  ;;  %s18_s11 = sshll.u32 %s101_s10, 4  ;;  %s17_s9 = int_to_ptr.hbm [resolvable:$true] %s16_s9  ;;  %s19_s11 = int_to_ptr.vmem [resolvable:$true] %s18_s11 }
   0x3   :  { %21 = dma.hbm_to_vmem [thread:$0]  %s17_s9, 32, %s19_s11, [#allocation3]  }
   0x4   :  { %97 = dma.done.wait [#allocation3], 32  }
   0x5   :  { %98 = vsyncadd [#allocation3], 4294967264  ;;  %s102_s12 = smov [#allocation5]   ;;  %s36_s16 = sshll.u32 %s120_s1, 4  ;;  %v27_v0 = vld [vmem:[#allocation2] sm:$0x3]  ;;  %s37_s16 = int_to_ptr.hbm [resolvable:$true] %s36_s16 }
   0x6   :  { %s34_s13 = sshll.u32 %s102_s12, 4  ;;  %28 = vst [vmem:[#allocation5] sm:$0x3] %v27_v0  ;;  %s35_s13 = int_to_ptr.vmem [resolvable:$true] %s34_s13 }
   0x7   :  { %39 = dma.vmem_to_hbm [thread:$0]  %s35_s13, 32, %s37_s16, [#allocation4]  }
   0x8   :  { %99 = dma.done.wait [#allocation4], 32  }
   0x9   :  { %100 = vsyncadd [#allocation4], 4294967264 }
   0xa   :  { %44 = vsyncpa [#allocation3], 1 }
   0xb   :  { %45 = vsyncpa [#allocation4], 1 }

</bundles_post_ra>
